<compile_context>
chip_gen: v7x
topology: tpu7x:2x2x1
jax: 0.10.0
libtpu: 0.0.40
codegen_flags: <defaults>
</compile_context>

<pallas_src>
from typing import NamedTuple, Optional

import numpy as np
import jax
import jax.numpy as jnp
from jax import lax
from jax.experimental import pallas as pl
from jax.experimental.pallas import tpu as pltpu


def _round_up(x, m):
    return (x + m - 1) // m * m


# ------------------------------ Pallas kernel ------------------------------ #
def _attend(e_dst, e_src, z_src, adj):
    """One GAT attention/aggregation step restricted to its live (dst x src) block.

    e_dst : [Rd, 1]  z_dst . a_dst (folded projection column K)
    e_src : [1, Rs]  z_src . a_src
    z_src : [Rs, C]  projected source features
    adj   : [Rd, Rs] int8, adj[j, i] = 1 iff edge i -> j
    returns [Rd, C]; dst rows with no in-edges -> 0 (DGL default).
    """
    adj_f = adj.astype(jnp.float32)
    mask = adj_f > 0.5
    e = jnp.where(mask, e_dst + e_src, jnp.float32(-1e30))
    m = jnp.max(e, axis=1, keepdims=True)
    # Rows with >= 1 edge: masked entries underflow to exactly 0 in exp, so the second
    # select on p is unnecessary.  Rows with no edges are zeroed via the degree, not denom.
    p = jnp.exp(e - m)
    denom = jnp.sum(p, axis=1, keepdims=True)
    has_edge = jnp.sum(adj_f, axis=1, keepdims=True) > 0.0
    inv = pl.reciprocal(jnp.where(has_edge, denom, 1.0), approx=True)
    # bf16 MXU operands; normalization applied AFTER aggregation (O(Rd*C), not O(Rd*Rs)).
    out = jnp.dot(p.astype(jnp.bfloat16), z_src.astype(jnp.bfloat16),
                  preferred_element_type=jnp.float32) * inv
    return jnp.where(has_edge, out, 0.0)


def _make_fusion_kernel(K, C, ne_pad, nk_pad, graph_layer, multi_step):
    n_in = 11 if graph_layer == 2 else 8

    def kernel(*refs):
        (h_ref, w_ref, asrc_k_ref, asrc_e_ref,
         adj_dir_ref, adj_und_ref, adj_kfe_ref, adj_efk_ref) = refs[:8]
        if graph_layer == 2:
            w2_kfe_ref, w2_efk_ref, asrc2_ref = refs[8:11]
        kn_out_ref, ex_out_ref = refs[n_in], refs[n_in + 1]

        def epilogue(z_all):
            z_e = z_all[:ne_pad, :]                  # exercise rows, all 4 layer blocks
            z_k = z_all[ne_pad:, :]                  # knowledge rows, all 4 layer blocks
            # e_src for all four layers, batched by SOURCE node group (2 small matmuls):
            #   knowledge sources: directed(0), undirected(1), e_from_k(2)
            #   exercise sources : k_from_e(0)
            es_k = lax.dot_general(asrc_k_ref[...], z_k, (((1,), (1,)), ((), ())),
                                   preferred_element_type=jnp.float32)   # [3, nk_pad]
            es_e = lax.dot_general(asrc_e_ref[...], z_e, (((1,), (1,)), ((), ())),
                                   preferred_element_type=jnp.float32)   # [1, ne_pad]

            # directed + undirected GAT over knowledge nodes (incremental accumulation).
            z_dir = z_k[:, 0 * C:1 * C]
            kn = _attend(z_dir[:, K:K + 1], es_k[0:1, :], z_dir, adj_dir_ref[...])
            z_und = z_k[:, 1 * C:2 * C]
            kn = kn + _attend(z_und[:, K:K + 1], es_k[1:2, :], z_und, adj_und_ref[...])

            # k_from_e: dst = knowledge, src = exercise (rectangular block).
            z_kfe_k = z_k[:, 2 * C:3 * C]
            z_kfe_e = z_e[:, 2 * C:3 * C]
            out_kfe = _attend(z_kfe_k[:, K:K + 1], es_e[0:1, :], z_kfe_e,
                              adj_kfe_ref[...])
            # e_from_k: dst = exercise, src = knowledge (rectangular block).
            z_efk_e = z_e[:, 3 * C:4 * C]
            z_efk_k = z_k[:, 3 * C:4 * C]
            out_efk = _attend(z_efk_e[:, K:K + 1], es_k[2:3, :], z_efk_k,
                              adj_efk_ref[...])

            if graph_layer == 2:
                # Second-level GraphLayers with the ReLU fused in (no HBM round trip).
                # With strictly-bipartite k_from_e / e_from_k graphs, the SOURCE groups
                # (exercise for k_from_e, knowledge for e_from_k) have zero in-degree at
                # level 1, so their level-1 features -- and hence the level-2 source
                # projections -- are exactly zero (matches DGL's zero-fill semantics).
                h2_kfe = jnp.maximum(out_kfe, 0.0)
                z2_kfe_dst = jnp.dot(h2_kfe, w2_kfe_ref[...],
                                     preferred_element_type=jnp.float32)
                z2_kfe_src = jnp.zeros((ne_pad, C), jnp.float32)
                es2_kfe = lax.dot_general(asrc2_ref[0:1, :], z2_kfe_src,
                                          (((1,), (1,)), ((), ())),
                                          preferred_element_type=jnp.float32)
                out_kfe = _attend(z2_kfe_dst[:, K:K + 1], es2_kfe, z2_kfe_src,
                                  adj_kfe_ref[...])

                h2_efk = jnp.maximum(out_efk, 0.0)
                z2_efk_dst = jnp.dot(h2_efk, w2_efk_ref[...],
                                     preferred_element_type=jnp.float32)
                z2_efk_src = jnp.zeros((nk_pad, C), jnp.float32)
                es2_efk = lax.dot_general(asrc2_ref[1:2, :], z2_efk_src,
                                          (((1,), (1,)), ((), ())),
                                          preferred_element_type=jnp.float32)
                out_efk = _attend(z2_efk_dst[:, K:K + 1], es2_efk, z2_efk_src,
                                  adj_efk_ref[...])

            kn = kn + out_kfe
            kn_out_ref[...] = kn.astype(kn_out_ref.dtype)
            ex_out_ref[...] = out_efk.astype(ex_out_ref.dtype)

        if multi_step:
            z_acc = refs[n_in + 2]
            k = pl.program_id(0)

            @pl.when(k == 0)
            def _():
                z_acc[...] = jnp.zeros_like(z_acc)

            # One bf16 MXU pass per Din tile for all four projections (+ folded a_dst cols).
            z_acc[...] += jnp.dot(h_ref[...], w_ref[...],
                                  preferred_element_type=jnp.float32)

            @pl.when(k == pl.num_programs(0) - 1)
            def _():
                epilogue(z_acc[...])
        else:
            # Din fits in a single tile: no accumulator scratch / pl.when round trip.
            epilogue(jnp.dot(h_ref[...], w_ref[...],
                             preferred_element_type=jnp.float32))

    return kernel


# --------------------------- one-time preprocessing -------------------------- #
def _extend_weights(w_t, a_src, a_dst, in_rows, C):
    """Fold a_dst into the projection: W_ext[:, :K] = W^T, W_ext[:, K] = W^T @ a_dst."""
    din, K = w_t.shape
    w_ext = jnp.zeros((in_rows, C), jnp.float32)
    w_ext = w_ext.at[:din, :K].set(w_t)
    w_ext = w_ext.at[:din, K].set(w_t @ a_dst[0])
    a_src_pad = jnp.zeros((C,), jnp.float32).at[:K].set(a_src[0])
    return w_ext, a_src_pad


class FusionPrep(NamedTuple):
    w_all: jax.Array            # [in_pad, 4C] bf16
    asrc_ksrc: jax.Array        # [3, 4C] f32  (layers with knowledge sources)
    asrc_esrc: jax.Array        # [1, 4C] f32  (layer with exercise sources)
    adj_dir: jax.Array          # [nk_pad, nk_pad] int8
    adj_und: jax.Array          # [nk_pad, nk_pad] int8
    adj_kfe: jax.Array          # [nk_pad, ne_pad] int8 (dst=knowledge, src=exercise)
    adj_efk: jax.Array          # [ne_pad, nk_pad] int8 (dst=exercise, src=knowledge)
    w2_kfe: Optional[jax.Array]
    w2_efk: Optional[jax.Array]
    asrc2: Optional[jax.Array]
    K: int
    C: int
    n_exer: int
    n_k: int
    ne_pad: int
    nk_pad: int
    in_dim: int
    in_pad: int
    tk: int
    num_k: int
    graph_layer: int


def prepare_fusion(params, local_map, n_exer, graph_layer, din_tile=512):
    """One-time prep (hoisted out of the per-call forward): weight concat + a_dst folding,
    a_src assembly, int8 rectangular adjacency blocks.

    din_tile: Din reduction tile. 512 is a safe default for v7x (64 MiB VMEM per core);
    raise to 1024 on v5e/v6e (128 MiB VMEM) for the real Din = 4096 / 5120 configs.
    """
    w_t_dir = np.asarray(params["directed_gat"][0])
    in_dim, K = w_t_dir.shape
    n_k = K                                           # knowledge nodes == n_knowledge
    ne_pad = _round_up(n_exer, 8)
    nk_pad = _round_up(n_k, 8)
    C = _round_up(K + 1, 128)                         # lane-dense per-layer block (+fold col)

    if in_dim <= din_tile:
        tk, in_pad = in_dim, in_dim
    else:
        tk = din_tile
        in_pad = _round_up(in_dim, tk)
    num_k = in_pad // tk

    # Concatenate the 4 first-level extended projections -> one bf16 matmul in-kernel.
    w_exts, a_srcs = [], []
    for name in ("directed_gat", "undirected_gat", "k_from_e_gat", "e_from_k_gat"):
        w_ext, a_src_pad = _extend_weights(*params[name], in_pad, C)
        w_exts.append(w_ext)
        a_srcs.append(a_src_pad)
    w_all = jnp.concatenate(w_exts, axis=1).astype(jnp.bfloat16)   # [in_pad, 4C]

    asrc_ksrc = jnp.zeros((3, 4 * C), jnp.float32)
    asrc_ksrc = asrc_ksrc.at[0, 0 * C:1 * C].set(a_srcs[0])   # directed   (kn sources)
    asrc_ksrc = asrc_ksrc.at[1, 1 * C:2 * C].set(a_srcs[1])   # undirected (kn sources)
    asrc_ksrc = asrc_ksrc.at[2, 3 * C:4 * C].set(a_srcs[3])   # e_from_k   (kn sources)
    asrc_esrc = jnp.zeros((1, 4 * C), jnp.float32)
    asrc_esrc = asrc_esrc.at[0, 2 * C:3 * C].set(a_srcs[2])   # k_from_e   (ex sources)

    def pad_i8(a, rows, cols):
        a = np.asarray(a)
        out = np.zeros((rows, cols), np.int8)
        out[:a.shape[0], :a.shape[1]] = (a > 0.5)
        return jnp.asarray(out)

    kfe = np.asarray(local_map["k_from_e"])
    efk = np.asarray(local_map["e_from_k"])
    # The k_from_e / e_from_k graphs of this model are strictly bipartite; keep only the
    # live rectangular adjacency block (2-4x less epilogue work, 4x less VMEM as int8).
    assert kfe[:n_exer, :].sum() == 0 and kfe[:, n_exer:].sum() == 0, \
        "k_from_e must contain exercise->knowledge edges only"
    assert efk[n_exer:, :].sum() == 0 and efk[:, :n_exer].sum() == 0, \
        "e_from_k must contain knowledge->exercise edges only"

    adj_dir = pad_i8(local_map["directed_g"], nk_pad, nk_pad)
    adj_und = pad_i8(local_map["undirected_g"], nk_pad, nk_pad)
    adj_kfe = pad_i8(kfe[n_exer:, :n_exer], nk_pad, ne_pad)
    adj_efk = pad_i8(efk[:n_exer, n_exer:], ne_pad, nk_pad)

    if graph_layer == 2:
        w2_kfe, a_src2_kfe = _extend_weights(*params["k_from_e_gat2"], C, C)
        w2_efk, a_src2_efk = _extend_weights(*params["e_from_k_gat2"], C, C)
        asrc2 = jnp.stack([a_src2_kfe, a_src2_efk], axis=0)
    else:
        w2_kfe = w2_efk = asrc2 = None

    return FusionPrep(w_all, asrc_ksrc, asrc_esrc, adj_dir, adj_und, adj_kfe, adj_efk,
                      w2_kfe, w2_efk, asrc2,
                      K, C, n_exer, n_k, ne_pad, nk_pad, in_dim, in_pad, tk, num_k,
                      graph_layer)


# ------------------------------- per-call forward ---------------------------- #
def _const_spec(shape):
    return pl.BlockSpec(shape, lambda *_: (0,) * len(shape))


def _fusion_forward(prep, kn_emb, exer_emb):
    p = prep
    C4 = 4 * p.C
    n_pad = p.ne_pad + p.nk_pad

    # Only the node features are assembled per call; bf16 halves the dominant HBM stream.
    h = jnp.zeros((n_pad, p.in_pad), jnp.bfloat16)
    h = h.at[:p.n_exer, :p.in_dim].set(exer_emb.astype(jnp.bfloat16))
    h = h.at[p.ne_pad:p.ne_pad + p.n_k, :p.in_dim].set(kn_emb.astype(jnp.bfloat16))

    inputs = [h, p.w_all, p.asrc_ksrc, p.asrc_esrc,
              p.adj_dir, p.adj_und, p.adj_kfe, p.adj_efk]
    in_specs = [
        pl.BlockSpec((n_pad, p.tk), lambda kk: (0, kk)),
        pl.BlockSpec((p.tk, C4), lambda kk: (kk, 0)),
        _const_spec((3, C4)),
        _const_spec((1, C4)),
        _const_spec((p.nk_pad, p.nk_pad)),
        _const_spec((p.nk_pad, p.nk_pad)),
        _const_spec((p.nk_pad, p.ne_pad)),
        _const_spec((p.ne_pad, p.nk_pad)),
    ]
    # TODO(synk): pipeline_mode=pl.Buffered(1) on the constant-index blocks above would
    # halve their double-buffered VMEM footprint; left off pending validation of
    # pipeline_mode support on the deployed jax/Mosaic version.
    if p.graph_layer == 2:
        inputs += [p.w2_kfe, p.w2_efk, p.asrc2]
        in_specs += [_const_spec((p.C, p.C)), _const_spec((p.C, p.C)),
                     _const_spec((2, p.C))]

    multi = p.num_k > 1
    kernel = _make_fusion_kernel(p.K, p.C, p.ne_pad, p.nk_pad, p.graph_layer, multi)
    scratch = [pltpu.VMEM((n_pad, C4), jnp.float32)] if multi else []

    # Explicit VMEM budget: double-buffered bf16 h/w Din tiles + constant blocks +
    # f32 accumulator + outputs + headroom.  Capped at 64 MiB (v7x physical per-core VMEM).
    vmem_est = (2 * n_pad * p.tk * 2                        # h tile (bf16) x 2 buffers
                + 2 * p.tk * C4 * 2                         # w tile (bf16) x 2 buffers
                + 2 * (2 * p.nk_pad * p.nk_pad
                       + 2 * p.nk_pad * p.ne_pad)           # int8 adjacency x 2 buffers
                + 2 * 4 * C4 * 4                            # a_src rows
                + n_pad * C4 * 4                            # z accumulator (f32)
                + 2 * (p.nk_pad + p.ne_pad) * p.C * 4       # outputs
                + 2 * (2 * p.C * p.C + 2 * p.C) * 4         # level-2 weights
                + (8 << 20))                                # headroom
    vmem_limit = int(min(64 * 2 ** 20, max(vmem_est, 24 * 2 ** 20)))

    # TODO(synk): on v7x (2 TensorCores) add a leading "parallel" grid axis splitting the
    # four independent GAT layers across cores (dir+und vs k_from_e+e_from_k).
    kn_out_p, ex_out_p = pl.pallas_call(
        kernel,
        out_shape=(jax.ShapeDtypeStruct((p.nk_pad, p.C), jnp.float32),
                   jax.ShapeDtypeStruct((p.ne_pad, p.C), jnp.float32)),
        grid=(p.num_k,),
        in_specs=in_specs,
        out_specs=(_const_spec((p.nk_pad, p.C)), _const_spec((p.ne_pad, p.C))),
        scratch_shapes=scratch,
        compiler_params=pltpu.CompilerParams(
            dimension_semantics=("arbitrary",),
            vmem_limit_bytes=vmem_limit),
    )(*inputs)

    return kn_out_p[:p.n_k, :p.K], ex_out_p[:p.n_exer, :p.K]


def make_fusion_forward(prep):
    """Return a jitted forward closed over the one-time-prepped constants."""
    return jax.jit(lambda kn_emb, exer_emb: _fusion_forward(prep, kn_emb, exer_emb))


# ------------------------- parameter construction -------------------------- #
def init_graph_layer(key, in_dim, out_dim):
    k1, k2 = jax.random.split(key)
    # nn.Linear(in_dim, out_dim, bias=False).weight : [out_dim, in_dim]; we store W^T
    w_t = (0.1 * jax.random.normal(k1, (in_dim, out_dim))).astype(jnp.float32)
    # nn.Linear(2*out_dim, 1, bias=False).weight : [1, 2*out_dim]
    attn = (0.1 * jax.random.normal(k2, (1, 2 * out_dim))).astype(jnp.float32)
    a_src = attn[:, :out_dim]   # applied to z_src
    a_dst = attn[:, out_dim:]   # applied to z_dst
    return (w_t, a_src, a_dst)


# ------------------------------ pure-JAX ref -------------------------------- #
def gat_layer_ref(h, w_t, a_src, a_dst, adj):
    z = h @ w_t
    e = (z @ a_dst[0])[:, None] + (z @ a_src[0])[None, :]
    mask = adj > 0.5
    e = jnp.where(mask, e, -1e30)
    m = jnp.max(e, axis=1, keepdims=True)
    p = jnp.where(mask, jnp.exp(e - m), 0.0)
    denom = p.sum(axis=1, keepdims=True)
    alpha = p / jnp.where(denom > 0, denom, 1.0)
    out = alpha @ z
    return jnp.where(denom > 0, out, 0.0)


def fusion_forward_ref(params, kn_emb, exer_emb, local_map, n_exer, graph_layer):
    k_directed = gat_layer_ref(kn_emb, *params["directed_gat"], local_map["directed_g"])
    k_undirected = gat_layer_ref(kn_emb, *params["undirected_gat"], local_map["undirected_g"])
    e_k_graph = jnp.concatenate([exer_emb, kn_emb], axis=0)
    k_from_e_graph = gat_layer_ref(e_k_graph, *params["k_from_e_gat"], local_map["k_from_e"])
    e_from_k_graph = gat_layer_ref(e_k_graph, *params["e_from_k_gat"], local_map["e_from_k"])
    if graph_layer == 2:
        k_from_e_graph = gat_layer_ref(jnp.maximum(k_from_e_graph, 0.0),
                                       *params["k_from_e_gat2"], local_map["k_from_e"])
        e_from_k_graph = gat_layer_ref(jnp.maximum(e_from_k_graph, 0.0),
                                       *params["e_from_k_gat2"], local_map["e_from_k"])
    kn_out = k_directed + k_undirected + k_from_e_graph[n_exer:]
    exer_out = e_from_k_graph[:n_exer]
    return kn_out, exer_out


# ----------------------------------- main ----------------------------------- #
if __name__ == "__main__":
    n_knowledge = 8     # args.n_knowledge
    n_exer = 6          # args.n_exer
    N = n_exer + n_knowledge

    key = jax.random.PRNGKey(0)
    ks = jax.random.split(key, 12)

    # dense adjacency masks (adj[j, i] = 1 iff edge i -> j); stand-ins for DGL graphs
    adj_dir = (jax.random.uniform(ks[2], (n_knowledge, n_knowledge)) < 0.4).astype(jnp.float32)
    sym = (jax.random.uniform(ks[3], (n_knowledge, n_knowledge)) < 0.4).astype(jnp.float32)
    adj_und = jnp.maximum(sym, sym.T)
    ke = (jax.random.uniform(ks[4], (n_knowledge, n_exer)) < 0.5).astype(jnp.float32)
    adj_kfe = jnp.zeros((N, N), jnp.float32).at[n_exer:, :n_exer].set(ke)
    ek = (jax.random.uniform(ks[5], (n_exer, n_knowledge)) < 0.5).astype(jnp.float32)
    adj_efk = jnp.zeros((N, N), jnp.float32).at[:n_exer, n_exer:].set(ek)

    local_map = {
        "directed_g": adj_dir,
        "undirected_g": adj_und,
        "k_from_e": adj_kfe,
        "e_from_k": adj_efk,
    }

    # Two Din configs: 32 exercises the single-tile path, 1280 the pipelined multi-tile
    # reduction path (small stand-ins for the real 384 / 4096 / 5120 LLM embedding widths).
    for input_dim in (32, 1280):
        kn_emb = (0.5 * jax.random.normal(ks[0], (n_knowledge, input_dim))).astype(jnp.float32)
        exer_emb = (0.5 * jax.random.normal(ks[1], (n_exer, input_dim))).astype(jnp.float32)

        params = {
            "directed_gat":   init_graph_layer(ks[6], input_dim, n_knowledge),
            "undirected_gat": init_graph_layer(ks[7], input_dim, n_knowledge),
            "k_from_e_gat":   init_graph_layer(ks[8], input_dim, n_knowledge),
            "e_from_k_gat":   init_graph_layer(ks[9], input_dim, n_knowledge),
            "k_from_e_gat2":  init_graph_layer(ks[10], n_knowledge, n_knowledge),
            "e_from_k_gat2":  init_graph_layer(ks[11], n_knowledge, n_knowledge),
        }

        # exercise both the 4-layer (graph_layer=1) and 6-layer (graph_layer=2) stacks
        for graph_layer in (1, 2):
            prep = prepare_fusion(params, local_map, n_exer, graph_layer)
            fwd = make_fusion_forward(prep)
            kn_out, exer_out = fwd(kn_emb, exer_emb)
            jax.block_until_ready((kn_out, exer_out))

            kn_ref, exer_ref = fusion_forward_ref(params, kn_emb, exer_emb, local_map,
                                                  n_exer, graph_layer)
            assert kn_out.shape == (n_knowledge, n_knowledge)
            assert exer_out.shape == (n_exer, n_knowledge)
            # tolerances loosened deliberately: bf16 MXU operands + approx EUP reciprocal
            np.testing.assert_allclose(np.asarray(kn_out), np.asarray(kn_ref),
                                       rtol=3e-2, atol=3e-2)
            np.testing.assert_allclose(np.asarray(exer_out), np.asarray(exer_ref),
                                       rtol=3e-2, atol=3e-2)

    print("KERNEL_OK")
</pallas_src>

<mosaic_0001>
module attributes {stable_mosaic.version = 11 : i64} {
  func.func @kernel(%arg0: i32, %arg1: memref<16x32xbf16, #tpu.memory_space<vmem>>, %arg2: memref<32x512xbf16, #tpu.memory_space<vmem>>, %arg3: memref<3x512xf32, #tpu.memory_space<vmem>>, %arg4: memref<1x512xf32, #tpu.memory_space<vmem>>, %arg5: memref<8x8xi8, #tpu.memory_space<vmem>>, %arg6: memref<8x8xi8, #tpu.memory_space<vmem>>, %arg7: memref<8x8xi8, #tpu.memory_space<vmem>>, %arg8: memref<8x8xi8, #tpu.memory_space<vmem>>, %arg9: memref<8x128xf32, #tpu.memory_space<vmem>>, %arg10: memref<8x128xf32, #tpu.memory_space<vmem>>) attributes {dimension_semantics = [#tpu.dimension_semantics<arbitrary>], iteration_bounds = array<i64: 1>, scalar_prefetch = 0 : i64, scratch_operands = 0 : i64, tpu.core_type = #tpu.core_type<tc>, window_params = [{transform_indices = @transform_0, window_bounds = array<i64: 16, 32>}, {transform_indices = @transform_1, window_bounds = array<i64: 32, 512>}, {pipeline_mode = #tpu.pipeline_mode<synchronous>, transform_indices = @transform_2, window_bounds = array<i64: 3, 512>}, {pipeline_mode = #tpu.pipeline_mode<synchronous>, transform_indices = @transform_3, window_bounds = array<i64: 1, 512>}, {pipeline_mode = #tpu.pipeline_mode<synchronous>, transform_indices = @transform_4, window_bounds = array<i64: 8, 8>}, {pipeline_mode = #tpu.pipeline_mode<synchronous>, transform_indices = @transform_5, window_bounds = array<i64: 8, 8>}, {pipeline_mode = #tpu.pipeline_mode<synchronous>, transform_indices = @transform_6, window_bounds = array<i64: 8, 8>}, {pipeline_mode = #tpu.pipeline_mode<synchronous>, transform_indices = @transform_7, window_bounds = array<i64: 8, 8>}, {pipeline_mode = #tpu.pipeline_mode<synchronous>, transform_indices = @transform_8, window_bounds = array<i64: 8, 128>}, {pipeline_mode = #tpu.pipeline_mode<synchronous>, transform_indices = @transform_9, window_bounds = array<i64: 8, 128>}]} {
    %c0 = arith.constant 0 : index
    %c0_0 = arith.constant 0 : index
    %0 = vector.load %arg1[%c0, %c0_0] : memref<16x32xbf16, #tpu.memory_space<vmem>>, vector<16x32xbf16>
    %c0_1 = arith.constant 0 : index
    %c0_2 = arith.constant 0 : index
    %1 = vector.load %arg2[%c0_1, %c0_2] : memref<32x512xbf16, #tpu.memory_space<vmem>>, vector<32x512xbf16>
    %cst = arith.constant dense<0.000000e+00> : vector<16x512xf32>
    %2 = tpu.matmul %0, %1, %cst {dimension_numbers = #tpu.dot_dimension_numbers<[1], [0], [0], [1], [0, 0, 1, 1], [], []>} : vector<16x32xbf16>, vector<32x512xbf16>, vector<16x512xf32> -> vector<16x512xf32>
    %3 = vector.extract_strided_slice %2 {offsets = [0, 0], sizes = [8, 512], strides = [1, 1]} : vector<16x512xf32> to vector<8x512xf32>
    %4 = vector.extract_strided_slice %2 {offsets = [8, 0], sizes = [8, 512], strides = [1, 1]} : vector<16x512xf32> to vector<8x512xf32>
    %c0_3 = arith.constant 0 : index
    %c0_4 = arith.constant 0 : index
    %5 = vector.load %arg3[%c0_3, %c0_4] : memref<3x512xf32, #tpu.memory_space<vmem>>, vector<3x512xf32>
    %cst_5 = arith.constant dense<0.000000e+00> : vector<3x8xf32>
    %6 = tpu.matmul %5, %4, %cst_5 {dimension_numbers = #tpu.dot_dimension_numbers<[1], [1], [0], [0], [0, 0, 1, 0], [], []>} : vector<3x512xf32>, vector<8x512xf32>, vector<3x8xf32> -> vector<3x8xf32>
    %c0_6 = arith.constant 0 : index
    %c0_7 = arith.constant 0 : index
    %7 = vector.load %arg4[%c0_6, %c0_7] : memref<1x512xf32, #tpu.memory_space<vmem>>, vector<1x512xf32>
    %cst_8 = arith.constant dense<0.000000e+00> : vector<1x8xf32>
    %8 = tpu.matmul %7, %3, %cst_8 {dimension_numbers = #tpu.dot_dimension_numbers<[1], [1], [0], [0], [0, 0, 1, 0], [], []>} : vector<1x512xf32>, vector<8x512xf32>, vector<1x8xf32> -> vector<1x8xf32>
    %9 = vector.extract_strided_slice %4 {offsets = [0, 0], sizes = [8, 128], strides = [1, 1]} : vector<8x512xf32> to vector<8x128xf32>
    %10 = vector.extract_strided_slice %9 {offsets = [0, 8], sizes = [8, 1], strides = [1, 1]} : vector<8x128xf32> to vector<8x1xf32>
    %11 = vector.extract_strided_slice %6 {offsets = [0, 0], sizes = [1, 8], strides = [1, 1]} : vector<3x8xf32> to vector<1x8xf32>
    %c0_9 = arith.constant 0 : index
    %c0_10 = arith.constant 0 : index
    %12 = vector.load %arg5[%c0_9, %c0_10] : memref<8x8xi8, #tpu.memory_space<vmem>>, vector<8x8xi8>
    %13 = arith.sitofp %12 : vector<8x8xi8> to vector<8x8xf32>
    %cst_11 = arith.constant 5.000000e-01 : f32
    %14 = vector.broadcast %cst_11 : f32 to vector<8x8xf32>
    %15 = arith.cmpf ogt, %13, %14 : vector<8x8xf32>
    %16 = vector.broadcast %10 : vector<8x1xf32> to vector<8x8xf32>
    %17 = vector.broadcast %11 : vector<1x8xf32> to vector<8x8xf32>
    %18 = arith.addf %16, %17 : vector<8x8xf32>
    %cst_12 = arith.constant -1.000000e+30 : f32
    %19 = vector.broadcast %cst_12 : f32 to vector<8x8xf32>
    %20 = arith.select %15, %18, %19 : vector<8x8xi1>, vector<8x8xf32>
    %cst_13 = arith.constant dense<0xFF800000> : vector<8xf32>
    %21 = vector.multi_reduction <maximumf>, %20, %cst_13 [1] : vector<8x8xf32> to vector<8xf32>
    %22 = vector.shape_cast %21 : vector<8xf32> to vector<8x1xf32>
    %23 = vector.broadcast %22 : vector<8x1xf32> to vector<8x8xf32>
    %24 = arith.subf %20, %23 : vector<8x8xf32>
    %25 = math.exp %24 : vector<8x8xf32>
    %cst_14 = arith.constant dense<0.000000e+00> : vector<8xf32>
    %26 = vector.multi_reduction <add>, %25, %cst_14 [1] : vector<8x8xf32> to vector<8xf32>
    %27 = vector.shape_cast %26 : vector<8xf32> to vector<8x1xf32>
    %cst_15 = arith.constant dense<0.000000e+00> : vector<8xf32>
    %28 = vector.multi_reduction <add>, %13, %cst_15 [1] : vector<8x8xf32> to vector<8xf32>
    %29 = vector.shape_cast %28 : vector<8xf32> to vector<8x1xf32>
    %cst_16 = arith.constant 0.000000e+00 : f32
    %30 = vector.broadcast %cst_16 : f32 to vector<8x1xf32>
    %31 = arith.cmpf ogt, %29, %30 : vector<8x1xf32>
    %cst_17 = arith.constant 1.000000e+00 : f32
    %32 = vector.broadcast %cst_17 : f32 to vector<8x1xf32>
    %33 = arith.select %31, %27, %32 : vector<8x1xi1>, vector<8x1xf32>
    %34 = tpu.reciprocal %33 {approx = true} : vector<8x1xf32> -> vector<8x1xf32>
    %35 = arith.truncf %25 : vector<8x8xf32> to vector<8x8xbf16>
    %36 = arith.truncf %9 : vector<8x128xf32> to vector<8x128xbf16>
    %cst_18 = arith.constant dense<0.000000e+00> : vector<8x128xf32>
    %37 = tpu.matmul %35, %36, %cst_18 {dimension_numbers = #tpu.dot_dimension_numbers<[1], [0], [0], [1], [0, 0, 1, 1], [], []>} : vector<8x8xbf16>, vector<8x128xbf16>, vector<8x128xf32> -> vector<8x128xf32>
    %38 = vector.broadcast %34 : vector<8x1xf32> to vector<8x128xf32>
    %39 = arith.mulf %37, %38 : vector<8x128xf32>
    %cst_19 = arith.constant 0.000000e+00 : f32
    %40 = vector.shape_cast %31 : vector<8x1xi1> to vector<8x1xi1>
    %41 = vector.broadcast %40 : vector<8x1xi1> to vector<8x128xi1>
    %42 = vector.broadcast %cst_19 : f32 to vector<8x128xf32>
    %43 = arith.select %41, %39, %42 : vector<8x128xi1>, vector<8x128xf32>
    %44 = vector.extract_strided_slice %4 {offsets = [0, 128], sizes = [8, 128], strides = [1, 1]} : vector<8x512xf32> to vector<8x128xf32>
    %45 = vector.extract_strided_slice %44 {offsets = [0, 8], sizes = [8, 1], strides = [1, 1]} : vector<8x128xf32> to vector<8x1xf32>
    %46 = vector.extract_strided_slice %6 {offsets = [1, 0], sizes = [1, 8], strides = [1, 1]} : vector<3x8xf32> to vector<1x8xf32>
    %c0_20 = arith.constant 0 : index
    %c0_21 = arith.constant 0 : index
    %47 = vector.load %arg6[%c0_20, %c0_21] : memref<8x8xi8, #tpu.memory_space<vmem>>, vector<8x8xi8>
    %48 = arith.sitofp %47 : vector<8x8xi8> to vector<8x8xf32>
    %cst_22 = arith.constant 5.000000e-01 : f32
    %49 = vector.broadcast %cst_22 : f32 to vector<8x8xf32>
    %50 = arith.cmpf ogt, %48, %49 : vector<8x8xf32>
    %51 = vector.broadcast %45 : vector<8x1xf32> to vector<8x8xf32>
    %52 = vector.broadcast %46 : vector<1x8xf32> to vector<8x8xf32>
    %53 = arith.addf %51, %52 : vector<8x8xf32>
    %cst_23 = arith.constant -1.000000e+30 : f32
    %54 = vector.broadcast %cst_23 : f32 to vector<8x8xf32>
    %55 = arith.select %50, %53, %54 : vector<8x8xi1>, vector<8x8xf32>
    %cst_24 = arith.constant dense<0xFF800000> : vector<8xf32>
    %56 = vector.multi_reduction <maximumf>, %55, %cst_24 [1] : vector<8x8xf32> to vector<8xf32>
    %57 = vector.shape_cast %56 : vector<8xf32> to vector<8x1xf32>
    %58 = vector.broadcast %57 : vector<8x1xf32> to vector<8x8xf32>
    %59 = arith.subf %55, %58 : vector<8x8xf32>
    %60 = math.exp %59 : vector<8x8xf32>
    %cst_25 = arith.constant dense<0.000000e+00> : vector<8xf32>
    %61 = vector.multi_reduction <add>, %60, %cst_25 [1] : vector<8x8xf32> to vector<8xf32>
    %62 = vector.shape_cast %61 : vector<8xf32> to vector<8x1xf32>
    %cst_26 = arith.constant dense<0.000000e+00> : vector<8xf32>
    %63 = vector.multi_reduction <add>, %48, %cst_26 [1] : vector<8x8xf32> to vector<8xf32>
    %64 = vector.shape_cast %63 : vector<8xf32> to vector<8x1xf32>
    %cst_27 = arith.constant 0.000000e+00 : f32
    %65 = vector.broadcast %cst_27 : f32 to vector<8x1xf32>
    %66 = arith.cmpf ogt, %64, %65 : vector<8x1xf32>
    %cst_28 = arith.constant 1.000000e+00 : f32
    %67 = vector.broadcast %cst_28 : f32 to vector<8x1xf32>
    %68 = arith.select %66, %62, %67 : vector<8x1xi1>, vector<8x1xf32>
    %69 = tpu.reciprocal %68 {approx = true} : vector<8x1xf32> -> vector<8x1xf32>
    %70 = arith.truncf %60 : vector<8x8xf32> to vector<8x8xbf16>
    %71 = arith.truncf %44 : vector<8x128xf32> to vector<8x128xbf16>
    %cst_29 = arith.constant dense<0.000000e+00> : vector<8x128xf32>
    %72 = tpu.matmul %70, %71, %cst_29 {dimension_numbers = #tpu.dot_dimension_numbers<[1], [0], [0], [1], [0, 0, 1, 1], [], []>} : vector<8x8xbf16>, vector<8x128xbf16>, vector<8x128xf32> -> vector<8x128xf32>
    %73 = vector.broadcast %69 : vector<8x1xf32> to vector<8x128xf32>
    %74 = arith.mulf %72, %73 : vector<8x128xf32>
    %cst_30 = arith.constant 0.000000e+00 : f32
    %75 = vector.shape_cast %66 : vector<8x1xi1> to vector<8x1xi1>
    %76 = vector.broadcast %75 : vector<8x1xi1> to vector<8x128xi1>
    %77 = vector.broadcast %cst_30 : f32 to vector<8x128xf32>
    %78 = arith.select %76, %74, %77 : vector<8x128xi1>, vector<8x128xf32>
    %79 = arith.addf %43, %78 : vector<8x128xf32>
    %80 = vector.extract_strided_slice %4 {offsets = [0, 256], sizes = [8, 128], strides = [1, 1]} : vector<8x512xf32> to vector<8x128xf32>
    %81 = vector.extract_strided_slice %3 {offsets = [0, 256], sizes = [8, 128], strides = [1, 1]} : vector<8x512xf32> to vector<8x128xf32>
    %82 = vector.extract_strided_slice %80 {offsets = [0, 8], sizes = [8, 1], strides = [1, 1]} : vector<8x128xf32> to vector<8x1xf32>
    %c0_31 = arith.constant 0 : index
    %c0_32 = arith.constant 0 : index
    %83 = vector.load %arg7[%c0_31, %c0_32] : memref<8x8xi8, #tpu.memory_space<vmem>>, vector<8x8xi8>
    %84 = arith.sitofp %83 : vector<8x8xi8> to vector<8x8xf32>
    %cst_33 = arith.constant 5.000000e-01 : f32
    %85 = vector.broadcast %cst_33 : f32 to vector<8x8xf32>
    %86 = arith.cmpf ogt, %84, %85 : vector<8x8xf32>
    %87 = vector.broadcast %82 : vector<8x1xf32> to vector<8x8xf32>
    %88 = vector.broadcast %8 : vector<1x8xf32> to vector<8x8xf32>
    %89 = arith.addf %87, %88 : vector<8x8xf32>
    %cst_34 = arith.constant -1.000000e+30 : f32
    %90 = vector.broadcast %cst_34 : f32 to vector<8x8xf32>
    %91 = arith.select %86, %89, %90 : vector<8x8xi1>, vector<8x8xf32>
    %cst_35 = arith.constant dense<0xFF800000> : vector<8xf32>
    %92 = vector.multi_reduction <maximumf>, %91, %cst_35 [1] : vector<8x8xf32> to vector<8xf32>
    %93 = vector.shape_cast %92 : vector<8xf32> to vector<8x1xf32>
    %94 = vector.broadcast %93 : vector<8x1xf32> to vector<8x8xf32>
    %95 = arith.subf %91, %94 : vector<8x8xf32>
    %96 = math.exp %95 : vector<8x8xf32>
    %cst_36 = arith.constant dense<0.000000e+00> : vector<8xf32>
    %97 = vector.multi_reduction <add>, %96, %cst_36 [1] : vector<8x8xf32> to vector<8xf32>
    %98 = vector.shape_cast %97 : vector<8xf32> to vector<8x1xf32>
    %cst_37 = arith.constant dense<0.000000e+00> : vector<8xf32>
    %99 = vector.multi_reduction <add>, %84, %cst_37 [1] : vector<8x8xf32> to vector<8xf32>
    %100 = vector.shape_cast %99 : vector<8xf32> to vector<8x1xf32>
    %cst_38 = arith.constant 0.000000e+00 : f32
    %101 = vector.broadcast %cst_38 : f32 to vector<8x1xf32>
    %102 = arith.cmpf ogt, %100, %101 : vector<8x1xf32>
    %cst_39 = arith.constant 1.000000e+00 : f32
    %103 = vector.broadcast %cst_39 : f32 to vector<8x1xf32>
    %104 = arith.select %102, %98, %103 : vector<8x1xi1>, vector<8x1xf32>
    %105 = tpu.reciprocal %104 {approx = true} : vector<8x1xf32> -> vector<8x1xf32>
    %106 = arith.truncf %96 : vector<8x8xf32> to vector<8x8xbf16>
    %107 = arith.truncf %81 : vector<8x128xf32> to vector<8x128xbf16>
    %cst_40 = arith.constant dense<0.000000e+00> : vector<8x128xf32>
    %108 = tpu.matmul %106, %107, %cst_40 {dimension_numbers = #tpu.dot_dimension_numbers<[1], [0], [0], [1], [0, 0, 1, 1], [], []>} : vector<8x8xbf16>, vector<8x128xbf16>, vector<8x128xf32> -> vector<8x128xf32>
    %109 = vector.broadcast %105 : vector<8x1xf32> to vector<8x128xf32>
    %110 = arith.mulf %108, %109 : vector<8x128xf32>
    %cst_41 = arith.constant 0.000000e+00 : f32
    %111 = vector.shape_cast %102 : vector<8x1xi1> to vector<8x1xi1>
    %112 = vector.broadcast %111 : vector<8x1xi1> to vector<8x128xi1>
    %113 = vector.broadcast %cst_41 : f32 to vector<8x128xf32>
    %114 = arith.select %112, %110, %113 : vector<8x128xi1>, vector<8x128xf32>
    %115 = vector.extract_strided_slice %3 {offsets = [0, 384], sizes = [8, 128], strides = [1, 1]} : vector<8x512xf32> to vector<8x128xf32>
    %116 = vector.extract_strided_slice %4 {offsets = [0, 384], sizes = [8, 128], strides = [1, 1]} : vector<8x512xf32> to vector<8x128xf32>
    %117 = vector.extract_strided_slice %115 {offsets = [0, 8], sizes = [8, 1], strides = [1, 1]} : vector<8x128xf32> to vector<8x1xf32>
    %118 = vector.extract_strided_slice %6 {offsets = [2, 0], sizes = [1, 8], strides = [1, 1]} : vector<3x8xf32> to vector<1x8xf32>
    %c0_42 = arith.constant 0 : index
    %c0_43 = arith.constant 0 : index
    %119 = vector.load %arg8[%c0_42, %c0_43] : memref<8x8xi8, #tpu.memory_space<vmem>>, vector<8x8xi8>
    %120 = arith.sitofp %119 : vector<8x8xi8> to vector<8x8xf32>
    %cst_44 = arith.constant 5.000000e-01 : f32
    %121 = vector.broadcast %cst_44 : f32 to vector<8x8xf32>
    %122 = arith.cmpf ogt, %120, %121 : vector<8x8xf32>
    %123 = vector.broadcast %117 : vector<8x1xf32> to vector<8x8xf32>
    %124 = vector.broadcast %118 : vector<1x8xf32> to vector<8x8xf32>
    %125 = arith.addf %123, %124 : vector<8x8xf32>
    %cst_45 = arith.constant -1.000000e+30 : f32
    %126 = vector.broadcast %cst_45 : f32 to vector<8x8xf32>
    %127 = arith.select %122, %125, %126 : vector<8x8xi1>, vector<8x8xf32>
    %cst_46 = arith.constant dense<0xFF800000> : vector<8xf32>
    %128 = vector.multi_reduction <maximumf>, %127, %cst_46 [1] : vector<8x8xf32> to vector<8xf32>
    %129 = vector.shape_cast %128 : vector<8xf32> to vector<8x1xf32>
    %130 = vector.broadcast %129 : vector<8x1xf32> to vector<8x8xf32>
    %131 = arith.subf %127, %130 : vector<8x8xf32>
    %132 = math.exp %131 : vector<8x8xf32>
    %cst_47 = arith.constant dense<0.000000e+00> : vector<8xf32>
    %133 = vector.multi_reduction <add>, %132, %cst_47 [1] : vector<8x8xf32> to vector<8xf32>
    %134 = vector.shape_cast %133 : vector<8xf32> to vector<8x1xf32>
    %cst_48 = arith.constant dense<0.000000e+00> : vector<8xf32>
    %135 = vector.multi_reduction <add>, %120, %cst_48 [1] : vector<8x8xf32> to vector<8xf32>
    %136 = vector.shape_cast %135 : vector<8xf32> to vector<8x1xf32>
    %cst_49 = arith.constant 0.000000e+00 : f32
    %137 = vector.broadcast %cst_49 : f32 to vector<8x1xf32>
    %138 = arith.cmpf ogt, %136, %137 : vector<8x1xf32>
    %cst_50 = arith.constant 1.000000e+00 : f32
    %139 = vector.broadcast %cst_50 : f32 to vector<8x1xf32>
    %140 = arith.select %138, %134, %139 : vector<8x1xi1>, vector<8x1xf32>
    %141 = tpu.reciprocal %140 {approx = true} : vector<8x1xf32> -> vector<8x1xf32>
    %142 = arith.truncf %132 : vector<8x8xf32> to vector<8x8xbf16>
    %143 = arith.truncf %116 : vector<8x128xf32> to vector<8x128xbf16>
    %cst_51 = arith.constant dense<0.000000e+00> : vector<8x128xf32>
    %144 = tpu.matmul %142, %143, %cst_51 {dimension_numbers = #tpu.dot_dimension_numbers<[1], [0], [0], [1], [0, 0, 1, 1], [], []>} : vector<8x8xbf16>, vector<8x128xbf16>, vector<8x128xf32> -> vector<8x128xf32>
    %145 = vector.broadcast %141 : vector<8x1xf32> to vector<8x128xf32>
    %146 = arith.mulf %144, %145 : vector<8x128xf32>
    %cst_52 = arith.constant 0.000000e+00 : f32
    %147 = vector.shape_cast %138 : vector<8x1xi1> to vector<8x1xi1>
    %148 = vector.broadcast %147 : vector<8x1xi1> to vector<8x128xi1>
    %149 = vector.broadcast %cst_52 : f32 to vector<8x128xf32>
    %150 = arith.select %148, %146, %149 : vector<8x128xi1>, vector<8x128xf32>
    %151 = arith.addf %79, %114 : vector<8x128xf32>
    %c0_53 = arith.constant 0 : index
    %c0_54 = arith.constant 0 : index
    %152 = vector.load %arg9[%c0_53, %c0_54] : memref<8x128xf32, #tpu.memory_space<vmem>>, vector<8x128xf32>
    tpu.vector_store %arg9[%c0_53, %c0_54], %151 {strides = array<i32>} : memref<8x128xf32, #tpu.memory_space<vmem>>, vector<8x128xf32>,
    %c0_55 = arith.constant 0 : index
    %c0_56 = arith.constant 0 : index
    %153 = vector.load %arg10[%c0_55, %c0_56] : memref<8x128xf32, #tpu.memory_space<vmem>>, vector<8x128xf32>
    tpu.vector_store %arg10[%c0_55, %c0_56], %150 {strides = array<i32>} : memref<8x128xf32, #tpu.memory_space<vmem>>, vector<8x128xf32>,
    return
  }
  func.func @transform_0(%arg0: i32) -> (i32, i32) {
    %c0_i32 = arith.constant 0 : i32
    %c0_i32_0 = arith.constant 0 : i32
    return %c0_i32, %arg0 : i32, i32
  }
  func.func @transform_1(%arg0: i32) -> (i32, i32) {
    %c0_i32 = arith.constant 0 : i32
    %c0_i32_0 = arith.constant 0 : i32
    return %arg0, %c0_i32 : i32, i32
  }
  func.func @transform_2(%arg0: i32) -> (i32, i32) {
    %c0_i32 = arith.constant 0 : i32
    %c0_i32_0 = arith.constant 0 : i32
    %c0_i32_1 = arith.constant 0 : i32
    return %c0_i32, %c0_i32_0 : i32, i32
  }
  func.func @transform_3(%arg0: i32) -> (i32, i32) {
    %c0_i32 = arith.constant 0 : i32
    %c0_i32_0 = arith.constant 0 : i32
    %c0_i32_1 = arith.constant 0 : i32
    return %c0_i32, %c0_i32_0 : i32, i32
  }
  func.func @transform_4(%arg0: i32) -> (i32, i32) {
    %c0_i32 = arith.constant 0 : i32
    %c0_i32_0 = arith.constant 0 : i32
    %c0_i32_1 = arith.constant 0 : i32
    return %c0_i32, %c0_i32_0 : i32, i32
  }
  func.func @transform_5(%arg0: i32) -> (i32, i32) {
    %c0_i32 = arith.constant 0 : i32
    %c0_i32_0 = arith.constant 0 : i32
    %c0_i32_1 = arith.constant 0 : i32
    return %c0_i32, %c0_i32_0 : i32, i32
  }
  func.func @transform_6(%arg0: i32) -> (i32, i32) {
    %c0_i32 = arith.constant 0 : i32
    %c0_i32_0 = arith.constant 0 : i32
    %c0_i32_1 = arith.constant 0 : i32
    return %c0_i32, %c0_i32_0 : i32, i32
  }
  func.func @transform_7(%arg0: i32) -> (i32, i32) {
    %c0_i32 = arith.constant 0 : i32
    %c0_i32_0 = arith.constant 0 : i32
    %c0_i32_1 = arith.constant 0 : i32
    return %c0_i32, %c0_i32_0 : i32, i32
  }
  func.func @transform_8(%arg0: i32) -> (i32, i32) {
    %c0_i32 = arith.constant 0 : i32
    %c0_i32_0 = arith.constant 0 : i32
    %c0_i32_1 = arith.constant 0 : i32
    return %c0_i32, %c0_i32_0 : i32, i32
  }
  func.func @transform_9(%arg0: i32) -> (i32, i32) {
    %c0_i32 = arith.constant 0 : i32
    %c0_i32_0 = arith.constant 0 : i32
    %c0_i32_1 = arith.constant 0 : i32
    return %c0_i32, %c0_i32_0 : i32, i32
  }
}

</mosaic_0001>

<bundles_post_ra>
// kernel: _lambda_.1
= control target key start
LH: loop header
LB: loop body
LE: loop exit
PB: predicated region body
PF: predicated region fallthrough
CT: control target
= control target key end

     0   :  { %15 = vsyncpa [#allocation3], 0  ;;  %v989_v2 = vmov 0   ;;  %s1185_s0 = inlined_call_operand.vmem [shape: bf16[16,32], index: 0, kind: input, shape index: {}]   ;;  %s1186_s1 = inlined_call_operand.vmem [shape: bf16[32,512], index: 1, kind: input, shape index: {}]   ;;  %s1187_s2 = inlined_call_operand.vmem [shape: f32[3,512], index: 2, kind: input, shape index: {}]   ;;  %s1188_s3 = inlined_call_operand.vmem [shape: f32[1,512], index: 3, kind: input, shape index: {}]   ;;  %s1189_s4 = inlined_call_operand.vmem [shape: s8[8,8], index: 4, kind: input, shape index: {}]   ;;  %s1190_s5 = inlined_call_operand.vmem [shape: s8[8,8], index: 5, kind: input, shape index: {}]   ;;  %s1191_s6 = inlined_call_operand.vmem [shape: s8[8,8], index: 6, kind: input, shape index: {}]   ;;  %s1192_s7 = inlined_call_operand.vmem [shape: s8[8,8], index: 7, kind: input, shape index: {}]   ;;  %s1193_s8 = inlined_call_operand.hbm [shape: f32[8,128], index: 8, kind: output, shape index: {0}]   ;;  %s1194_s9 = inlined_call_operand.hbm [shape: f32[8,128], index: 9, kind: output, shape index: {1}]  }
   0x1   :  { %v910_v0 = vld [vmem:[%s1186_s1 + $0x4] ss:$16 sps:$4 sm:$0xff]   ;;  %v912_v1 = vld [vmem:[%s1186_s1] ss:$16 sps:$4 sm:$0xff]   ;;  %125 = vmatprep.mubr.bf16.mxu0 %v989_v2  ;;  %168 = vmatprep.mubr.bf16.mxu1 %v989_v2  ;;  %v913_v3 = vld [vmem:[%s1186_s1 + $0xc] ss:$16 sps:$4 sm:$0xff]  }
   0x2   :  { %93 = vmatprep.subr.bf16.mxu0 %v910_v0  ;;  %v915_v4 = vld [vmem:[%s1186_s1 + $0x8] ss:$16 sps:$4 sm:$0xff]   ;;  %v916_v5 = vld [vmem:[%s1186_s1 + $0x24] ss:$16 sps:$4 sm:$0xff]   ;;  %v918_v6 = vld [vmem:[%s1186_s1 + $0x20] ss:$16 sps:$4 sm:$0xff]   ;;  %136 = vmatprep.subr.bf16.mxu1 %v913_v3 }
   0x3   :  { %94 = vmatpush1.bf16.msra.mxu0 %v912_v1  ;;  %v919_v7 = vld [vmem:[%s1186_s1 + $0x2c] ss:$16 sps:$4 sm:$0xff]   ;;  %137 = vmatpush1.bf16.msra.mxu1 %v915_v4  ;;  %v921_v8 = vld [vmem:[%s1186_s1 + $0x28] ss:$16 sps:$4 sm:$0xff]   ;;  %v922_v9 = vld [vmem:[%s1185_s0] sm:$0xff]  }
   0x4   :  { %95 = vmatprep.subr.bf16.mxu0 %v916_v5  ;;  %138 = vmatprep.subr.bf16.mxu1 %v919_v7 }
   0x5   :  { %16 = vsyncpa [#allocation5], 0  ;;  %vm89_vm0 = vcmask 261120   ;;  %v329_v10 = vlaneseq  ;;  %v990_v13 = vmov 8   ;;  %v327_v14 = vld [vmem:[%s1188_s3] sm:$0xf] }
   0x6   :  { %908 = vset.pattern.permute.xlu0 %v990_v13  ;;  %909 = vset.pattern.permute.xlu1 %v990_v13  ;;  %v179_v16 = vld [vmem:[%s1187_s2] sm:$0x77]  ;;  %v180_v29 = vld [vmem:[%s1187_s2 + $0x8] sm:$0x77]  ;;  %vm525_vm1 = vcmask 1043456   ;;  %v991_v38 = vmov 0.0  }
   0x7   :  { %96 = vmatpush1.bf16.msra.mxu0 %v918_v6  ;;  %139 = vmatpush1.bf16.msra.mxu1 %v921_v8  ;;  %v1072_v11 = vshrl.u32 %v329_v10, 7  ;;  %v183_v17 = vcombine.high %v179_v16, %v179_v16  ;;  %v184_v35 = vcombine.high %v180_v29, %v180_v29  ;;  %v573_v43 = vld [vmem:[%s1190_s5] sm:$0x3]  ;;  %vm504_vm5 = vcmask 64512  }
   0x8   :  { %v489_v44 = vld [vmem:[%s1189_s4] sm:$0x3]  ;;  %v574_v46 = vunpack.c.0.s8 %v573_v43  ;;  %vm992_vm7 = vmmov 0   ;;  %s993_s4 = smov [#allocation4]  }
   0x9   :  { %v335_v12 = vsub.s32 1, %v1072_v11  ;;  %v343_v18 = vsub.s32 3, %v1072_v11  ;;  %v1085_v20 = vsub.s32 0, %v1072_v11  ;;  %v339_v34 = vsub.s32 2, %v1072_v11  ;;  %v656_v45 = vld [vmem:[%s1191_s6] sm:$0x3] }
   0xa   :  { %860 = vmatmul.mubr.msk.bf16.vlgmr.msra.gmra.mrb[0].mxu0 %vm89_vm0, %v922_v9  ;;  %861 = vmatmul.mubr.msk.bf16.vlgmr.msra.gmra.mrb[0].mxu1 %vm89_vm0, %v922_v9  ;;  %v490_v47 = vunpack.c.0.s8 %v489_v44  ;;  %v657_v49 = vunpack.c.0.s8 %v656_v45  ;;  %v738_v50 = vld [vmem:[%s1192_s7] sm:$0x3]  ;;  %v575_v52 = vcvt.s32.f32 %v574_v46  ;;  %s839_s5 = sshll.u32 %s993_s4, 4  ;;  %s994_s6 = smov [#allocation2]   ;;  %s840_s5 = int_to_ptr.vmem [resolvable:$true] %s839_s5 }
   0xb   :  { %v336_v15 = vrot.slane %v327_v14, %v335_v12  ;;  %251 = vmatprep.mubr.f32.mxu0 %v183_v17  ;;  %v344_v19 = vrot.slane %v327_v14, %v343_v18  ;;  %v332_v25 = vrot.slane %v327_v14, %v1085_v20  ;;  %v340_v39 = vrot.slane %v327_v14, %v339_v34  ;;  %s829_s7 = sshll.u32 %s994_s6, 4  ;;  %s941_s16 = scalar_lea.vmem %s840_s5, 128  ;;  %s1154_s7 = int_to_ptr.vmem [resolvable:$true] %s829_s7 }
   0xc   :  { %v491_v53 = vcvt.s32.f32 %v490_v47  ;;  %v658_v58 = vcvt.s32.f32 %v657_v49  ;;  %v739_v59 = vunpack.c.0.s8 %v738_v50  ;;  %vm576_vm2 = vcmp.gt.f32.partialorder %v575_v52, 0.5  ;;  %p942_p0 = scmp.ne.s32.totalorder %s840_s5, %s941_s16  ;;  %p946_p1 = scmp.lt.s32.totalorder %s840_s5, %s840_s5 }
   0xd   :  { %413 = vmatprep.mubr.f32.mxu1 %v336_v15  ;;  %p947_p2 = scmp.lt.s32.totalorder %s941_s16, %s941_s16 }
   0xe   :  { %vm492_vm3 = vcmp.gt.f32.partialorder %v491_v53, 0.5  ;;  %vm659_vm4 = vcmp.gt.f32.partialorder %v658_v58, 0.5  ;;  %v740_v4 = vcvt.s32.f32 %v739_v59  ;;  %v514_v15 = vsel %vm504_vm5, %v491_v53, 0.0 }
   0xf   :  { %v680_v17 = vsel %vm504_vm5, %v658_v58, 0.0  ;;  %p948_p3 = por %p947_p2, %p946_p1 }
  0x10   :  { %vm741_vm6 = vcmp.gt.f32.partialorder %v740_v4, 0.5  ;;  %v762_v18 = vsel %vm504_vm5, %v740_v4, 0.0 }
  0x11   :  { %p949_p4 = pnand %p948_p3, %p942_p0 }
  0xdd   :  { %v127_v21 = vpop.f32.mrb[0].mxu0  ;;  %v170_v24 = vpop.f32.mrb[0].mxu1 }
  0xde   :  { %v129_v22 = vpop.f32.mrb[1].mxu0  ;;  %v687_v26 = vpack.c.bf16 %v170_v24, %v170_v24  ;;  %v172_v27 = vpop.f32.mrb[1].mxu1 }
  0xdf   :  { %v131_v23 = vpop.f32.mrb[2].mxu0  ;;  %349 = vmatprep.subr.mxu1 %v129_v22  ;;  %v174_v30 = vpop.f32.mrb[2].mxu1 }
  0xe0   :  { %350 = vmatpush1.xpose.msra.mxu1 %v127_v21  ;;  %495 = vperm.xlu0 %908, %v131_v23   ;;  %v133_v28 = vpop.f32.mrb[3].mxu0  ;;  %v176_v31 = vpop.f32.mrb[3].mxu1  ;;  %v1092_v32 = vsel %vm525_vm1, %v687_v26, 0  ;;  %v521_v40 = vpack.c.bf16 %v131_v23, %v131_v23 }
  0xe1   :  { %187 = vmatprep.subr.mxu0 %v133_v28  ;;  %419 = vmatprep.subr.mxu1 %v172_v27  ;;  %v769_v33 = vpack.c.bf16 %v176_v31, %v176_v31  ;;  %v604_v37 = vpack.c.bf16 %v133_v28, %v133_v28 }
  0xe2   :  { %662 = vperm.xlu1 %909, %v174_v30   ;;  %188 = vmatpush1.xpose.msra.mxu0 %v131_v23  ;;  %v527_v42 = vsel %vm525_vm1, %v521_v40, 0 }
  0xe3   :  { %414 = vmatmul.mubr.f32.vlgmr.msra.gmra.mrb[4].mxu1 %v332_v25  ;;  %257 = vmatprep.subr.mxu0 %v176_v31  ;;  %v1096_v36 = vsel %vm525_vm1, %v769_v33, 0  ;;  %v609_v41 = vsel %vm525_vm1, %v604_v37, 0 }
  0xe4   :  { %579 = vperm.xlu0 %908, %v133_v28   ;;  %420 = vmatpush1.xpose.msra.mxu1 %v170_v24 }
  0xe5   :  { %252 = vmatmul.mubr.f32.vlgmr.msra.gmra.mrb[4].mxu0 %v179_v16  ;;  %483 = vmatprep.mubr.f32.mxu1 %v344_v19  ;;  %v597_v16 = vsel %vm504_vm5, %v575_v52, 0.0 }
  0xe6   :  { %744 = vperm.xlu1 %909, %v172_v27   ;;  %258 = vmatpush1.xpose.msra.mxu0 %v174_v30 }
  0xe7   :  { %880 = vmatprep.subr.bf16.mxu1 %v991_v38  ;;  %321 = vmatprep.mubr.f32.mxu0 %v184_v35 }
  0xe8   :  { %874 = vmatprep.subr.bf16.mxu0 %v991_v38 }
  0xeb   :  { %484 = vmatmul.mubr.f32.vlgmr.msra.gmra.mrb[4].mxu1 %v340_v39 }
  0xec   :  { %881 = vmatpush3.bf16.msra.mxu1 %v609_v41  ;;  %882 = vmatprep.mubr.msk.bf16.mxu1 %vm992_vm7, %v991_v38 }
  0xed   :  { %322 = vmatmul.mubr.f32.vlgmr.msra.gmra.mrb[4].mxu0 %v180_v29  ;;  %892 = vmatprep.subr.bf16.mxu1 %v991_v38 }
  0xee   :  { %875 = vmatpush3.bf16.msra.mxu0 %v527_v42  ;;  %876 = vmatprep.mubr.msk.bf16.mxu0 %vm992_vm7, %v991_v38 }
  0xef   :  { %886 = vmatprep.subr.bf16.mxu0 %v991_v38 }
 0x15f   :  { %v496_v48 = vpop.permute.xlu0 %495 }
 0x161   :  { %v663_v56 = vpop.permute.xlu1 %662 }
 0x163   :  { %v580_v63 = vpop.permute.xlu0 %579 }
 0x165   :  { %v745_v7 = vpop.permute.xlu1 %744 }
 0x1be   :  { %v485_v51 = vpop.f32.mrb[4].mxu1 }
 0x1bf   :  { %v668_v54 = vrot.slane %v485_v51, %v1085_v20  ;;  %v487_v55 = vpop.f32.mrb[5].mxu1 }
 0x1c0   :  { %v323_v57 = vpop.f32.mrb[4].mxu0 }
 0x1c1   :  { %v501_v60 = vrot.slane %v323_v57, %v1085_v20  ;;  %v585_v61 = vrot.slane %v323_v57, %v335_v12  ;;  %v325_v62 = vpop.f32.mrb[5].mxu0  ;;  %v669_v0 = vadd.f32 %v668_v54, %v663_v56  ;;  %v750_v1 = vrot.slane %v323_v57, %v339_v34 }
 0x1c3   :  { %v586_v2 = vadd.f32 %v585_v61, %v580_v63  ;;  %v502_v3 = vadd.f32 %v501_v60, %v496_v48  ;;  %v670_v10 = vsel %vm659_vm4, %v669_v0, -1e+30  ;;  %v751_v11 = vadd.f32 %v750_v1, %v745_v7 }
 0x1c4   :  { %v671_v12 = vsel %vm504_vm5, %v670_v10, -inf }
 0x1c5   :  { %v587_v5 = vsel %vm576_vm2, %v586_v2, -1e+30  ;;  %v503_v6 = vsel %vm492_vm3, %v502_v3, -1e+30  ;;  %v752_v13 = vsel %vm741_vm6, %v751_v11, -1e+30 }
 0x1c6   :  { %v588_v8 = vsel %vm504_vm5, %v587_v5, -inf  ;;  %v505_v9 = vsel %vm504_vm5, %v503_v6, -inf  ;;  %v753_v14 = vsel %vm504_vm5, %v752_v13, -inf }
 0x1c7   :  { %589 = vmax.xlane.f32.xlu1 %v588_v8  ;;  %506 = vmax.xlane.f32.xlu0 %v505_v9 }
 0x1cb   :  { %672 = vmax.xlane.f32.xlu0 %v671_v12 }
 0x1cf   :  { %754 = vmax.xlane.f32.xlu0 %v753_v14 }
 0x1d3   :  { %515 = vadd.xlane.f32.xlu0 %v514_v15 }
 0x1d7   :  { %598 = vadd.xlane.f32.xlu0 %v597_v16 }
 0x1db   :  { %681 = vadd.xlane.f32.xlu0 %v680_v17 }
 0x1df   :  { %763 = vadd.xlane.f32.xlu0 %v762_v18 }
 0x254   :  { %v590_v19 = vpop.xlane.xlu1 %589  ;;  %v507_v20 = vpop.xlane.xlu0 %506 }
 0x255   :  { %v591_v21 = vsub.f32 %v587_v5, %v590_v19  ;;  %v508_v22 = vsub.f32 %v503_v6, %v507_v20 }
 0x257   :  { %v592_v23 = vmul.f32 1.442695, %v591_v21  ;;  %v509_v24 = vmul.f32 1.442695, %v508_v22 }
 0x258   :  { %v673_v25 = vpop.xlane.xlu0 %672 }
 0x259   :  { %925 = vpow2.f32 %v592_v23  ;;  %v674_v26 = vsub.f32 %v670_v10, %v673_v25 }
 0x25a   :  { %927 = vpow2.f32 %v509_v24 }
 0x25b   :  { %v675_v27 = vmul.f32 1.442695, %v674_v26 }
 0x25c   :  { %v755_v28 = vpop.xlane.xlu0 %754 }
 0x25d   :  { %929 = vpow2.f32 %v675_v27  ;;  %v756_v29 = vsub.f32 %v752_v13, %v755_v28 }
 0x25f   :  { %v757_v30 = vmul.f32 1.442695, %v756_v29 }
 0x260   :  { %v516_v45 = vpop.xlane.xlu0 %515 }
 0x261   :  { %931 = vpow2.f32 %v757_v30  ;;  %vm517_vm9 = vcmp.gt.f32.partialorder %v516_v45, 0.0 }
 0x263   :  { %v926_v31 = vpop.eup %925 }
 0x264   :  { %v928_v33 = vpop.eup %927  ;;  %v603_v34 = vpack.c.bf16 %v926_v31, %v926_v31 }
 0x265   :  { %v520_v35 = vpack.c.bf16 %v928_v33, %v928_v33  ;;  %v511_v41 = vsel %vm504_vm5, %v928_v33, 0.0 }
 0x266   :  { %883 = vmatmul.mubr.msk.bf16.vlgmr.msra.gmra.mrb[8].mxu1 %vm504_vm5, %v603_v34 }
 0x267   :  { %v930_v37 = vpop.eup %929  ;;  %877 = vmatmul.mubr.msk.bf16.vlgmr.msra.gmra.mrb[8].mxu0 %vm504_vm5, %v520_v35  ;;  %893 = vmatpush3.bf16.msra.mxu1 %v1096_v36 }
 0x268   :  { %887 = vmatpush3.bf16.msra.mxu0 %v1092_v32  ;;  %v677_v39 = vsel %vm504_vm5, %v930_v37, 0.0  ;;  %888 = vmatprep.mubr.msk.bf16.mxu0 %vm992_vm7, %v991_v38  ;;  %v686_v43 = vpack.c.bf16 %v930_v37, %v930_v37  ;;  %v594_v32 = vsel %vm504_vm5, %v926_v31, 0.0 }
 0x269   :  { %678 = vadd.xlane.f32.xlu1 %v677_v39  ;;  %894 = vmatprep.mubr.msk.bf16.mxu1 %vm992_vm7, %v991_v38  ;;  %v599_v38 = vpop.xlane.xlu0 %598 }
 0x26a   :  { %vm600_vm8 = vcmp.gt.f32.partialorder %v599_v38, 0.0 }
 0x26b   :  { %v932_v40 = vpop.eup %931 }
 0x26c   :  { %v768_v42 = vpack.c.bf16 %v932_v40, %v932_v40  ;;  %v759_v36 = vsel %vm504_vm5, %v932_v40, 0.0 }
 0x26d   :  { %512 = vadd.xlane.f32.xlu1 %v511_v41  ;;  %v682_v48 = vpop.xlane.xlu0 %681 }
 0x26e   :  { %895 = vmatmul.mubr.msk.bf16.vlgmr.msra.gmra.mrb[12].mxu1 %vm504_vm5, %v768_v42  ;;  %vm683_vm11 = vcmp.gt.f32.partialorder %v682_v48, 0.0 }
 0x26f   :  { %889 = vmatmul.mubr.msk.bf16.vlgmr.msra.gmra.mrb[12].mxu0 %vm504_vm5, %v686_v43 }
 0x271   :  { %595 = vadd.xlane.f32.xlu1 %v594_v32  ;;  %v764_v51 = vpop.xlane.xlu0 %763 }
 0x272   :  { %vm765_vm10 = vcmp.gt.f32.partialorder %v764_v51, 0.0 }
 0x275   :  { %760 = vadd.xlane.f32.xlu1 %v759_v36 }
 0x2f6   :  { %v679_v44 = vpop.xlane.xlu1 %678 }
 0x2f7   :  { %v684_v54 = vsel %vm683_vm11, %v679_v44, 1.0 }
 0x2fa   :  { %v513_v46 = vpop.xlane.xlu1 %512 }
 0x2fb   :  { %v518_v50 = vsel %vm517_vm9, %v513_v46, 1.0 }
 0x2fe   :  { %v596_v47 = vpop.xlane.xlu1 %595 }
 0x2ff   :  { %v601_v49 = vsel %vm600_vm8, %v596_v47, 1.0 }
 0x300   :  { %933 = vrcp.f32 %v601_v49 }
 0x301   :  { %935 = vrcp.f32 %v518_v50 }
 0x302   :  { %v761_v52 = vpop.xlane.xlu1 %760 }
 0x303   :  { %v766_v53 = vsel %vm765_vm10, %v761_v52, 1.0 }
 0x304   :  { %937 = vrcp.f32 %v766_v53 }
 0x305   :  { %939 = vrcp.f32 %v684_v54 }
 0x30a   :  { %v934_v55 = vpop.eup %933 }
 0x30b   :  { %v936_v57 = vpop.eup %935 }
 0x30e   :  { %v938_v6 = vpop.eup %937 }
 0x30f   :  { %v940_v8 = vpop.eup %939 }
 0x339   :  { %v645_v56 = vpop.f32.mrb[8].mxu1 }
 0x33a   :  { %v563_v58 = vpop.f32.mrb[8].mxu0  ;;  %v651_v59 = vmul.f32 %v934_v55, %v645_v56  ;;  %v884_v60 = vpop.f32.mrb[9].mxu1 }
 0x33b   :  { %v569_v61 = vmul.f32 %v936_v57, %v563_v58  ;;  %v878_v62 = vpop.f32.mrb[9].mxu0  ;;  %v648_v63 = vpop.f32.mrb[10].mxu1 }
 0x33c   :  { %v654_v0 = vsel %vm600_vm8, %v651_v59, 0.0  ;;  %v566_v1 = vpop.f32.mrb[10].mxu0  ;;  %v885_v2 = vpop.f32.mrb[11].mxu1 }
 0x33d   :  { %v572_v3 = vsel %vm517_vm9, %v569_v61, 0.0  ;;  %v879_v4 = vpop.f32.mrb[11].mxu0 }
 0x33e   :  { %v655_v5 = vadd.f32 %v654_v0, %v572_v3 }
 0x341   :  { %v810_v7 = vpop.f32.mrb[12].mxu1 }
 0x342   :  { %v728_v9 = vpop.f32.mrb[12].mxu0  ;;  %v816_v10 = vmul.f32 %v938_v6, %v810_v7  ;;  %v896_v11 = vpop.f32.mrb[13].mxu1 }
 0x343   :  { %v734_v12 = vmul.f32 %v940_v8, %v728_v9  ;;  %v890_v13 = vpop.f32.mrb[13].mxu0  ;;  %v813_v14 = vpop.f32.mrb[14].mxu1 }
 0x344   :  { %v731_v15 = vpop.f32.mrb[14].mxu0  ;;  %v897_v16 = vpop.f32.mrb[15].mxu1  ;;  %v819_v17 = vsel %vm765_vm10, %v816_v10, 0.0 }
 0x345   :  { %v891_v18 = vpop.f32.mrb[15].mxu0  ;;  %v737_v19 = vsel %vm683_vm11, %v734_v12, 0.0  ;;  %822 = vst [vmem:[#allocation4] sm:$0xff] %v819_v17 }
 0x346   :  { %v820_v20 = vadd.f32 %v737_v19, %v655_v5 }
 0x347   :  { %952 = shalt.err (!%p949_p4)
}
 0x348   :  { %s953_s19 = scalar_lea.hbm %s1194_s9, 128 }
 0x349   :  { %p954_p5 = scmp.ne.s32.totalorder %s1194_s9, %s953_s19  ;;  %p957_p6 = scmp.lt.u32.totalorder %s953_s19, %s1194_s9 }
 0x34b   :  { %p959_p7 = pnand %p957_p6, %p954_p5 }
 0x34d   :  { %962 = shalt.err (!%p959_p7)
}
 0x34e   :  { %842 = dma.vmem_to_hbm [thread:$0]  %s840_s5, 128, %s1194_s9, [#allocation5]   ;;  %821 = vst [vmem:[#allocation2] sm:$0xff] %v820_v20 }
 0x34f   :  { %s963_s26 = scalar_lea.vmem %s1154_s7, 128  ;;  %p968_p9 = scmp.lt.s32.totalorder %s1154_s7, %s1154_s7 }
 0x350   :  { %p964_p8 = scmp.ne.s32.totalorder %s1154_s7, %s963_s26  ;;  %p969_p10 = scmp.lt.s32.totalorder %s963_s26, %s963_s26 }
 0x352   :  { %p970_p11 = por %p969_p10, %p968_p9 }
 0x354   :  { %p971_p12 = pnand %p970_p11, %p964_p8 }
 0x356   :  { %974 = shalt.err (!%p971_p12)
}
 0x357   :  { %s975_s0 = scalar_lea.hbm %s1193_s8, 128 }
 0x358   :  { %p976_p13 = scmp.ne.s32.totalorder %s1193_s8, %s975_s0  ;;  %p979_p0 = scmp.lt.u32.totalorder %s975_s0, %s1193_s8 }
 0x35a   :  { %p981_p1 = pnand %p979_p0, %p976_p13 }
 0x35c   :  { %984 = shalt.err (!%p981_p1)
}
 0x35d   :  { %832 = dma.vmem_to_hbm [thread:$0]  %s1154_s7, 128, %s1193_s8, [#allocation3]  }
 0x35e   :  { %985 = dma.done.wait [#allocation3], 128  }
 0x35f   :  { %986 = vsyncadd [#allocation3], 4294967168 }
 0x360   :  { %987 = dma.done.wait [#allocation5], 128  }
 0x361   :  { %988 = vsyncadd [#allocation5], 4294967168 }
 0x362   :  { %849 = vsyncpa [#allocation3], 1 }
 0x363   :  { %850 = vsyncpa [#allocation5], 1 }

</bundles_post_ra>
